<compile_context>
chip_gen: v6e
topology: v6e:2x2x1
jax: 0.10.0
libtpu: 0.0.40
codegen_flags: <defaults>
</compile_context>

<pallas_src>
import functools

import jax
import jax.numpy as jnp
from jax.experimental import pallas as pl
from jax.experimental.pallas import tpu as pltpu


# ---------------------------------------------------------------------------
# Kernels
# ---------------------------------------------------------------------------
def se_gate_kernel(x_ref, w1_ref, b1_ref, w2_ref, b2_ref, gate_ref, acc_ref,
                   *, inv_hw):
    """Phase 1: global avg-pool (tiled over HW) + gate MLP.

    x_ref:    (1, C, T_HW)  current HW tile
    w1_ref:   (Cr, C)       conv1 weight with bn1 scale folded in
    b1_ref:   (Cr, 1)       bn1 shift
    w2_ref:   (C, Cr)       conv2 weight with bn2 scale folded in
    b2_ref:   (C, 1)        bn2 shift
    gate_ref: (1, C, 1)     output gate (written on the last HW tile)
    acc_ref:  (C, 1)        VMEM accumulator for the spatial sum
    """
    j = pl.program_id(1)

    @pl.when(j == 0)
    def _():
        acc_ref[...] = jnp.zeros_like(acc_ref)

    # Lane-axis reduction over this HW tile.
    acc_ref[...] += jnp.sum(x_ref[0], axis=1, keepdims=True)         # (C, 1)

    @pl.when(j == pl.num_programs(1) - 1)
    def _():
        pooled = acc_ref[...] * inv_hw                                # (C, 1)
        # 1x1 conv #1 (+ folded BN) + ReLU   -> (Cr, 1)
        h = jnp.dot(w1_ref[...], pooled,
                    preferred_element_type=jnp.float32) + b1_ref[...]
        h = jnp.maximum(h, 0.0)
        # 1x1 conv #2 (+ folded BN) + HSigmoid -> (C, 1)
        g = jnp.dot(w2_ref[...], h,
                    preferred_element_type=jnp.float32) + b2_ref[...]
        gate_ref[0] = jnp.clip(g + 3.0, 0.0, 6.0) * (1.0 / 6.0)


def se_scale_kernel(x_ref, gate_ref, o_ref):
    """Phase 2: out = x * gate, gate broadcast across the HW (lane) axis."""
    # (C, T_HW) * (C, 1) -> (C, T_HW); wide unmasked lane-dense stores.
    o_ref[0] = x_ref[0] * gate_ref[0]


# ---------------------------------------------------------------------------
# Wrapper
# ---------------------------------------------------------------------------
def _pick_hw_tile(hw, c, dtype_bytes=4, vmem_budget=8 * 1024 * 1024):
    """Largest multiple of 128 dividing HW whose (4x double-buffered) block
    fits the budget. Falls back to the full HW extent if HW % 128 != 0."""
    if hw % 128 != 0:
        # TODO(synk): pad HW to a multiple of 128 for very large, non-aligned
        # spatial sizes; full-extent block is used here instead.
        return hw
    best = 128
    t = 128
    cap = min(hw, 8192)
    while t <= cap:
        if hw % t == 0 and c * t * dtype_bytes * 4 <= vmem_budget:
            best = t
        t += 128
    return best


_VMEM_LIMIT = 32 * 1024 * 1024


@jax.jit
def se_module(x_nchw, w1s, b1, w2s, b2):
    """x_nchw: (N, C, H, W); w1s: (Cr, C); b1: (Cr, 1); w2s: (C, Cr); b2: (C, 1)."""
    N, C, H, W = x_nchw.shape
    HW = H * W
    Cr = w1s.shape[0]

    # Pure reshape (no data movement): NCHW -> (N, C, HW), HW on lanes.
    x = x_nchw.reshape(N, C, HW)

    T = _pick_hw_tile(HW, C)
    nt = HW // T

    # ---- Phase 1: pooled mean + gate MLP -> (N, C, 1) ----
    gate = pl.pallas_call(
        functools.partial(se_gate_kernel, inv_hw=1.0 / HW),
        out_shape=jax.ShapeDtypeStruct((N, C, 1), jnp.float32),
        grid=(N, nt),
        in_specs=[
            pl.BlockSpec((1, C, T), lambda n, j: (n, 0, j)),
            pl.BlockSpec((Cr, C), lambda n, j: (0, 0)),
            pl.BlockSpec((Cr, 1), lambda n, j: (0, 0)),
            pl.BlockSpec((C, Cr), lambda n, j: (0, 0)),
            pl.BlockSpec((C, 1), lambda n, j: (0, 0)),
        ],
        out_specs=pl.BlockSpec((1, C, 1), lambda n, j: (n, 0, 0)),
        scratch_shapes=[pltpu.VMEM((C, 1), jnp.float32)],
        compiler_params=pltpu.CompilerParams(
            dimension_semantics=("parallel", "arbitrary"),
            vmem_limit_bytes=_VMEM_LIMIT,
        ),
    )(x, w1s, b1, w2s, b2)

    # ---- Phase 2: apply gate (both axes parallel -> megacore on v7x) ----
    out = pl.pallas_call(
        se_scale_kernel,
        out_shape=jax.ShapeDtypeStruct((N, C, HW), x.dtype),
        grid=(N, nt),
        in_specs=[
            pl.BlockSpec((1, C, T), lambda n, j: (n, 0, j)),
            pl.BlockSpec((1, C, 1), lambda n, j: (n, 0, 0)),
        ],
        out_specs=pl.BlockSpec((1, C, T), lambda n, j: (n, 0, j)),
        compiler_params=pltpu.CompilerParams(
            dimension_semantics=("parallel", "parallel"),
            vmem_limit_bytes=_VMEM_LIMIT,
        ),
    )(x, gate)

    # Pure reshape back to NCHW.
    return out.reshape(N, C, H, W)


# ---------------------------------------------------------------------------
# Parameters (synthetic, deterministic) + BN folding + pure-JAX reference
# ---------------------------------------------------------------------------
_EPS = 1e-5


def make_raw_params(key, in_size, reduction=4):
    """Synthetic parameters matching SeModule.__init__ shapes (inference mode)."""
    cr = in_size // reduction
    keys = jax.random.split(key, 8)

    # Conv2d weights (out, in, 1, 1) represented as (out, in) matrices.
    w1 = 0.2 * jax.random.normal(keys[0], (cr, in_size), jnp.float32)
    w2 = 0.2 * jax.random.normal(keys[1], (in_size, cr), jnp.float32)

    g1 = 1.0 + 0.1 * jax.random.normal(keys[2], (cr,), jnp.float32)
    beta1 = 0.05 * jnp.arange(cr, dtype=jnp.float32)
    m1 = 0.02 * jax.random.normal(keys[3], (cr,), jnp.float32)
    v1 = 1.0 + 0.1 * jnp.abs(jax.random.normal(keys[4], (cr,), jnp.float32))

    g2 = 1.0 + 0.1 * jax.random.normal(keys[5], (in_size,), jnp.float32)
    beta2 = 0.05 * jnp.arange(in_size, dtype=jnp.float32)
    m2 = 0.02 * jax.random.normal(keys[6], (in_size,), jnp.float32)
    v2 = 1.0 + 0.1 * jnp.abs(jax.random.normal(keys[7], (in_size,), jnp.float32))

    return w1, g1, beta1, m1, v1, w2, g2, beta2, m2, v2


def fold_params(w1, g1, beta1, m1, v1, w2, g2, beta2, m2, v2, eps=_EPS):
    """Fold inference-mode BN into the 1x1-conv weights (kernel-side params)."""
    s1 = g1 / jnp.sqrt(v1 + eps)
    s2 = g2 / jnp.sqrt(v2 + eps)
    w1s = w1 * s1[:, None]                    # (Cr, C)
    b1 = (beta1 - m1 * s1)[:, None]           # (Cr, 1)
    w2s = w2 * s2[:, None]                    # (C, Cr)
    b2 = (beta2 - m2 * s2)[:, None]           # (C, 1)
    return w1s, b1, w2s, b2


def se_reference(x, w1, g1, beta1, m1, v1, w2, g2, beta2, m2, v2, eps=_EPS):
    """Pure-JAX reference of SeModule.forward (inference-mode BN)."""
    pooled = jnp.mean(x, axis=(2, 3))                         # (N, C)
    h = pooled @ w1.T                                         # (N, Cr)
    h = (h - m1) / jnp.sqrt(v1 + eps) * g1 + beta1
    h = jnp.maximum(h, 0.0)
    g = h @ w2.T                                              # (N, C)
    g = (g - m2) / jnp.sqrt(v2 + eps) * g2 + beta2
    g = jnp.clip(g + 3.0, 0.0, 6.0) / 6.0
    return x * g[:, :, None, None]


if __name__ == "__main__":
    key = jax.random.PRNGKey(0)
    kx, kp = jax.random.split(key)

    N, C, H, W = 2, 8, 16, 16          # in_size=8, reduction=4 -> bottleneck=2
    x = jax.random.normal(kx, (N, C, H, W), jnp.float32)

    raw = make_raw_params(kp, C, reduction=4)
    w1s, b1, w2s, b2 = fold_params(*raw)

    out = se_module(x, w1s, b1, w2s, b2)
    out = jax.block_until_ready(out)

    ref = se_reference(x, *raw)
    assert out.shape == x.shape
    assert jnp.allclose(out, ref, atol=1e-5, rtol=1e-5), "mismatch vs reference"

    print("KERNEL_OK")
</pallas_src>

<mosaic_0001>
module attributes {stable_mosaic.version = 11 : i64} {
  func.func @se_gate_kernel(%arg0: i32, %arg1: i32, %arg2: memref<1x8x256xf32, #tpu.memory_space<vmem>>, %arg3: memref<2x8xf32, #tpu.memory_space<vmem>>, %arg4: memref<2x1xf32, #tpu.memory_space<vmem>>, %arg5: memref<8x2xf32, #tpu.memory_space<vmem>>, %arg6: memref<8x1xf32, #tpu.memory_space<vmem>>, %arg7: memref<1x8x1xf32, #tpu.memory_space<vmem>>, %arg8: memref<8x1xf32, #tpu.memory_space<vmem>>) attributes {dimension_semantics = [#tpu.dimension_semantics<parallel>, #tpu.dimension_semantics<arbitrary>], iteration_bounds = array<i64: 2, 1>, scalar_prefetch = 0 : i64, scratch_operands = 1 : i64, tpu.core_type = #tpu.core_type<tc>, window_params = [{transform_indices = @transform_0, window_bounds = array<i64: 1, 8, 256>}, {pipeline_mode = #tpu.pipeline_mode<synchronous>, transform_indices = @transform_1, window_bounds = array<i64: 2, 8>}, {pipeline_mode = #tpu.pipeline_mode<synchronous>, transform_indices = @transform_2, window_bounds = array<i64: 2, 1>}, {pipeline_mode = #tpu.pipeline_mode<synchronous>, transform_indices = @transform_3, window_bounds = array<i64: 8, 2>}, {pipeline_mode = #tpu.pipeline_mode<synchronous>, transform_indices = @transform_4, window_bounds = array<i64: 8, 1>}, {transform_indices = @transform_5, window_bounds = array<i64: 1, 8, 1>}]} {
    %c0_i32 = arith.constant 0 : i32
    %0 = arith.cmpi eq, %arg1, %c0_i32 : i32
    %1 = arith.extui %0 : i1 to i32
    %c0_i32_0 = arith.constant 0 : i32
    %2 = arith.cmpi ne, %1, %c0_i32_0 : i32
    scf.if %2 {
      %cst_9 = arith.constant 0.000000e+00 : f32
      %13 = vector.broadcast %cst_9 : f32 to vector<8x1xf32>
      %c0_10 = arith.constant 0 : index
      %c0_11 = arith.constant 0 : index
      %14 = vector.load %arg8[%c0_10, %c0_11] : memref<8x1xf32, #tpu.memory_space<vmem>>, vector<8x1xf32>
      tpu.vector_store %arg8[%c0_10, %c0_11], %13 {strides = array<i32>} : memref<8x1xf32, #tpu.memory_space<vmem>>, vector<8x1xf32>,
    } else {
    }
    %c0 = arith.constant 0 : index
    %c0_1 = arith.constant 0 : index
    %3 = vector.load %arg8[%c0, %c0_1] : memref<8x1xf32, #tpu.memory_space<vmem>>, vector<8x1xf32>
    %c0_2 = arith.constant 0 : index
    %c0_3 = arith.constant 0 : index
    %c0_4 = arith.constant 0 : index
    %4 = vector.load %arg2[%c0_2, %c0_3, %c0_4] : memref<1x8x256xf32, #tpu.memory_space<vmem>>, vector<1x8x256xf32>
    %5 = vector.shape_cast %4 : vector<1x8x256xf32> to vector<8x256xf32>
    %cst = arith.constant dense<0.000000e+00> : vector<8xf32>
    %6 = vector.multi_reduction <add>, %5, %cst [1] : vector<8x256xf32> to vector<8xf32>
    %7 = vector.shape_cast %6 : vector<8xf32> to vector<8x1xf32>
    %8 = arith.addf %3, %7 : vector<8x1xf32>
    %c0_5 = arith.constant 0 : index
    %c0_6 = arith.constant 0 : index
    %9 = vector.load %arg8[%c0_5, %c0_6] : memref<8x1xf32, #tpu.memory_space<vmem>>, vector<8x1xf32>
    tpu.vector_store %arg8[%c0_5, %c0_6], %8 {strides = array<i32>} : memref<8x1xf32, #tpu.memory_space<vmem>>, vector<8x1xf32>,
    %c0_i32_7 = arith.constant 0 : i32
    %10 = arith.cmpi eq, %arg1, %c0_i32_7 : i32
    %11 = arith.extui %10 : i1 to i32
    %c0_i32_8 = arith.constant 0 : i32
    %12 = arith.cmpi ne, %11, %c0_i32_8 : i32
    scf.if %12 {
      %c0_9 = arith.constant 0 : index
      %c0_10 = arith.constant 0 : index
      %13 = vector.load %arg8[%c0_9, %c0_10] : memref<8x1xf32, #tpu.memory_space<vmem>>, vector<8x1xf32>
      %cst_11 = arith.constant 3.906250e-03 : f32
      %14 = vector.broadcast %cst_11 : f32 to vector<8x1xf32>
      %15 = arith.mulf %13, %14 : vector<8x1xf32>
      %c0_12 = arith.constant 0 : index
      %c0_13 = arith.constant 0 : index
      %16 = vector.load %arg3[%c0_12, %c0_13] : memref<2x8xf32, #tpu.memory_space<vmem>>, vector<2x8xf32>
      %cst_14 = arith.constant dense<0.000000e+00> : vector<2x1xf32>
      %17 = tpu.matmul %16, %15, %cst_14 {dimension_numbers = #tpu.dot_dimension_numbers<[1], [0], [0], [1], [0, 0, 1, 1], [], []>} : vector<2x8xf32>, vector<8x1xf32>, vector<2x1xf32> -> vector<2x1xf32>
      %c0_15 = arith.constant 0 : index
      %c0_16 = arith.constant 0 : index
      %18 = vector.load %arg4[%c0_15, %c0_16] : memref<2x1xf32, #tpu.memory_space<vmem>>, vector<2x1xf32>
      %19 = arith.addf %17, %18 : vector<2x1xf32>
      %cst_17 = arith.constant 0.000000e+00 : f32
      %20 = vector.broadcast %cst_17 : f32 to vector<2x1xf32>
      %21 = arith.maximumf %19, %20 : vector<2x1xf32>
      %c0_18 = arith.constant 0 : index
      %c0_19 = arith.constant 0 : index
      %22 = vector.load %arg5[%c0_18, %c0_19] : memref<8x2xf32, #tpu.memory_space<vmem>>, vector<8x2xf32>
      %cst_20 = arith.constant dense<0.000000e+00> : vector<8x1xf32>
      %23 = tpu.matmul %22, %21, %cst_20 {dimension_numbers = #tpu.dot_dimension_numbers<[1], [0], [0], [1], [0, 0, 1, 1], [], []>} : vector<8x2xf32>, vector<2x1xf32>, vector<8x1xf32> -> vector<8x1xf32>
      %c0_21 = arith.constant 0 : index
      %c0_22 = arith.constant 0 : index
      %24 = vector.load %arg6[%c0_21, %c0_22] : memref<8x1xf32, #tpu.memory_space<vmem>>, vector<8x1xf32>
      %25 = arith.addf %23, %24 : vector<8x1xf32>
      %cst_23 = arith.constant 3.000000e+00 : f32
      %26 = vector.broadcast %cst_23 : f32 to vector<8x1xf32>
      %27 = arith.addf %25, %26 : vector<8x1xf32>
      %cst_24 = arith.constant 0.000000e+00 : f32
      %cst_25 = arith.constant 6.000000e+00 : f32
      %28 = vector.broadcast %cst_24 : f32 to vector<8x1xf32>
      %29 = arith.maximumf %28, %27 : vector<8x1xf32>
      %30 = vector.broadcast %cst_25 : f32 to vector<8x1xf32>
      %31 = arith.minimumf %30, %29 : vector<8x1xf32>
      %cst_26 = arith.constant 0.166666672 : f32
      %32 = vector.broadcast %cst_26 : f32 to vector<8x1xf32>
      %33 = arith.mulf %31, %32 : vector<8x1xf32>
      %c0_27 = arith.constant 0 : index
      %c0_28 = arith.constant 0 : index
      %c0_29 = arith.constant 0 : index
      %34 = vector.load %arg7[%c0_27, %c0_28, %c0_29] : memref<1x8x1xf32, #tpu.memory_space<vmem>>, vector<1x8x1xf32>
      %35 = vector.shape_cast %34 : vector<1x8x1xf32> to vector<8x1xf32>
      %36 = vector.shape_cast %33 : vector<8x1xf32> to vector<1x8x1xf32>
      tpu.vector_store %arg7[%c0_27, %c0_28, %c0_29], %36 {strides = array<i32>} : memref<1x8x1xf32, #tpu.memory_space<vmem>>, vector<1x8x1xf32>,
    } else {
    }
    return
  }
  func.func @transform_0(%arg0: i32, %arg1: i32) -> (i32, i32, i32) {
    %c0_i32 = arith.constant 0 : i32
    %c0_i32_0 = arith.constant 0 : i32
    return %arg0, %c0_i32, %arg1 : i32, i32, i32
  }
  func.func @transform_1(%arg0: i32, %arg1: i32) -> (i32, i32) {
    %c0_i32 = arith.constant 0 : i32
    %c0_i32_0 = arith.constant 0 : i32
    %c0_i32_1 = arith.constant 0 : i32
    return %c0_i32, %c0_i32_0 : i32, i32
  }
  func.func @transform_2(%arg0: i32, %arg1: i32) -> (i32, i32) {
    %c0_i32 = arith.constant 0 : i32
    %c0_i32_0 = arith.constant 0 : i32
    %c0_i32_1 = arith.constant 0 : i32
    return %c0_i32, %c0_i32_0 : i32, i32
  }
  func.func @transform_3(%arg0: i32, %arg1: i32) -> (i32, i32) {
    %c0_i32 = arith.constant 0 : i32
    %c0_i32_0 = arith.constant 0 : i32
    %c0_i32_1 = arith.constant 0 : i32
    return %c0_i32, %c0_i32_0 : i32, i32
  }
  func.func @transform_4(%arg0: i32, %arg1: i32) -> (i32, i32) {
    %c0_i32 = arith.constant 0 : i32
    %c0_i32_0 = arith.constant 0 : i32
    %c0_i32_1 = arith.constant 0 : i32
    return %c0_i32, %c0_i32_0 : i32, i32
  }
  func.func @transform_5(%arg0: i32, %arg1: i32) -> (i32, i32, i32) {
    %c0_i32 = arith.constant 0 : i32
    %c0_i32_0 = arith.constant 0 : i32
    %c0_i32_1 = arith.constant 0 : i32
    return %arg0, %c0_i32, %c0_i32_0 : i32, i32, i32
  }
}

module attributes {stable_mosaic.version = 11 : i64} {
  func.func @se_scale_kernel(%arg0: i32, %arg1: i32, %arg2: memref<1x8x256xf32, #tpu.memory_space<vmem>>, %arg3: memref<1x8x1xf32, #tpu.memory_space<vmem>>, %arg4: memref<1x8x256xf32, #tpu.memory_space<vmem>>) attributes {dimension_semantics = [#tpu.dimension_semantics<parallel>, #tpu.dimension_semantics<parallel>], iteration_bounds = array<i64: 2, 1>, scalar_prefetch = 0 : i64, scratch_operands = 0 : i64, tpu.core_type = #tpu.core_type<tc>, window_params = [{transform_indices = @transform_0, window_bounds = array<i64: 1, 8, 256>}, {transform_indices = @transform_1, window_bounds = array<i64: 1, 8, 1>}, {transform_indices = @transform_2, window_bounds = array<i64: 1, 8, 256>}]} {
    %c0 = arith.constant 0 : index
    %c0_0 = arith.constant 0 : index
    %c0_1 = arith.constant 0 : index
    %0 = vector.load %arg2[%c0, %c0_0, %c0_1] : memref<1x8x256xf32, #tpu.memory_space<vmem>>, vector<1x8x256xf32>
    %1 = vector.shape_cast %0 : vector<1x8x256xf32> to vector<8x256xf32>
    %c0_2 = arith.constant 0 : index
    %c0_3 = arith.constant 0 : index
    %c0_4 = arith.constant 0 : index
    %2 = vector.load %arg3[%c0_2, %c0_3, %c0_4] : memref<1x8x1xf32, #tpu.memory_space<vmem>>, vector<1x8x1xf32>
    %3 = vector.shape_cast %2 : vector<1x8x1xf32> to vector<8x1xf32>
    %4 = vector.broadcast %3 : vector<8x1xf32> to vector<8x256xf32>
    %5 = arith.mulf %1, %4 : vector<8x256xf32>
    %c0_5 = arith.constant 0 : index
    %c0_6 = arith.constant 0 : index
    %c0_7 = arith.constant 0 : index
    %6 = vector.load %arg4[%c0_5, %c0_6, %c0_7] : memref<1x8x256xf32, #tpu.memory_space<vmem>>, vector<1x8x256xf32>
    %7 = vector.shape_cast %6 : vector<1x8x256xf32> to vector<8x256xf32>
    %8 = vector.shape_cast %5 : vector<8x256xf32> to vector<1x8x256xf32>
    tpu.vector_store %arg4[%c0_5, %c0_6, %c0_7], %8 {strides = array<i32>} : memref<1x8x256xf32, #tpu.memory_space<vmem>>, vector<1x8x256xf32>,
    return
  }
  func.func @transform_0(%arg0: i32, %arg1: i32) -> (i32, i32, i32) {
    %c0_i32 = arith.constant 0 : i32
    %c0_i32_0 = arith.constant 0 : i32
    return %arg0, %c0_i32, %arg1 : i32, i32, i32
  }
  func.func @transform_1(%arg0: i32, %arg1: i32) -> (i32, i32, i32) {
    %c0_i32 = arith.constant 0 : i32
    %c0_i32_0 = arith.constant 0 : i32
    %c0_i32_1 = arith.constant 0 : i32
    return %arg0, %c0_i32, %c0_i32_0 : i32, i32, i32
  }
  func.func @transform_2(%arg0: i32, %arg1: i32) -> (i32, i32, i32) {
    %c0_i32 = arith.constant 0 : i32
    %c0_i32_0 = arith.constant 0 : i32
    return %arg0, %c0_i32, %arg1 : i32, i32, i32
  }
}

</mosaic_0001>

<bundles_post_ra>
// kernel: se_module.3
= control target key start
LH: loop header
LB: loop body
LE: loop exit
PB: predicated region body
PF: predicated region fallthrough
CT: control target
= control target key end

     0   :  { %s391_s9 = smov 0   ;;  %s393_s10 = smov 0   ;;  %s424_s0 = inlined_call_operand.vmem [shape: f32[2,8,256], index: 0, kind: input, shape index: {}]   ;;  %s425_s1 = inlined_call_operand.vmem [shape: f32[2,8,1], index: 1, kind: input, shape index: {}]   ;;  %s426_s2 = inlined_call_operand.vmem [shape: f32[2,8,256], index: 2, kind: output, shape index: {}]  }
   0x1   :  { %s395_s11 = smov 0  }
   0x2 LB: > { %s24_s12 = sadd.s32 1, %s369_s10  ;;  %p315_p0 = scmp.ge.s32.totalorder %s373_s11, 1  ;;  %s373_s11 = sphi %s395_s11, %s12_s11   ;;  %s369_s10 = sphi %s393_s10, %s428_s10   ;;  %s365_s9 = sphi %s391_s9, %s427_s9  }
   0x3   : > { %p26_p1 = scmp.ge.s32.totalorder %s24_s12, 2  ;;  %p142_p2 = scmp.lt.s32.totalorder %s373_s11, 3 }
   0x5   : > { %s430_s12 = smov (%p26_p1, %s24_s12), 0  ;;  %p143_p3 = pnand %p315_p0, %p142_p2 }
   0x6   : > { %p177_p4 = scmp.lt.s32.totalorder (!%p143_p3), %s365_s9, 1 }
   0x7   : > { %146 = sbr.rel (%p143_p3) target bundleno = 143 (0x8f), region = 28 }
   0xc   : > { %v375_v0 = vmov 0   ;;  %s432_s9 = smov (!%p177_p4, %s365_s9), 1 }
   0xd   : > { %350 = vset.pattern.permute.xlu0 %v375_v0  ;;  %s318_s13 = sshll.u32 %s432_s9, 3  ;;  %s323_s17 = sshll.u32 %s432_s9, 4 }
   0xe   : > { %s189_s16 = scalar_lea.vmem %s425_s1, %s318_s13  ;;  %s184_s20 = scalar_lea.vmem %s424_s0, %s323_s17 }
   0xf   : > { %v202_v1 = vld [vmem:[%s189_s16] sm:$0xff]  ;;  %v201_v3 = vld [vmem:[%s184_s20 + $0x8] sm:$0xff]  ;;  %s198_s23 = scalar_lea.vmem %s426_s2, %s323_s17 }
  0x10   : > { %205 = vperm.xlu0 %350, %v202_v1   ;;  %v200_v2 = vld [vmem:[%s184_s20] sm:$0xff] }
  0x8b   : > { %v206_v4 = vpop.permute.xlu0 %205 }
  0x8c   : > { %v208_v5 = vmul.f32 %v206_v4, %v200_v2  ;;  %v209_v6 = vmul.f32 %v206_v4, %v201_v3 }
  0x8e   : > { %210 = vst [vmem:[%s198_s23] sm:$0xff] %v208_v5  ;;  %211 = vst [vmem:[%s198_s23 + $0x8] sm:$0xff] %v209_v6 }
  0x8f PF: > { %s12_s11 = sadd.s32 1, %s373_s11   ;;  %s427_s9 = smov %s369_s10 }
  0x90   : > { %p9_p5 = scmp.ge.s32.totalorder %s12_s11, 4   ;;  %s428_s10 = smov %s430_s12 }
  0x92   :  { %11 = sbr.rel (!%p9_p5) target bundleno = 2 (0x2), region = 61 }

// kernel: se_module.2
= control target key start
LH: loop header
LB: loop body
LE: loop exit
PB: predicated region body
PF: predicated region fallthrough
CT: control target
= control target key end

     0   :  { %s610_s18 = smov 0   ;;  %s612_s19 = smov 0   ;;  %s662_s0 = inlined_call_operand.vmem [shape: f32[2,8,256], index: 0, kind: input, shape index: {}]   ;;  %s663_s1 = inlined_call_operand.vmem [shape: f32[2,8], index: 1, kind: input, shape index: {}]   ;;  %s664_s2 = inlined_call_operand.vmem [shape: f32[2,1], index: 2, kind: input, shape index: {}]   ;;  %s665_s3 = inlined_call_operand.vmem [shape: f32[8,2], index: 3, kind: input, shape index: {}]   ;;  %s666_s4 = inlined_call_operand.vmem [shape: f32[8,1], index: 4, kind: input, shape index: {}]   ;;  %s667_s5 = inlined_call_operand.vmem [shape: f32[2,8,1], index: 5, kind: output, shape index: {}]  }
   0x1   :  { %s614_s20 = smov 0  }
   0x2 LB: > { %s27_s21 = sadd.s32 1, %s572_s19  ;;  %p504_p0 = scmp.ge.s32.totalorder %s576_s20, 1  ;;  %s576_s20 = sphi %s614_s20, %s15_s20   ;;  %s572_s19 = sphi %s612_s19, %s669_s19   ;;  %s568_s18 = sphi %s610_s18, %s668_s18  }
   0x3   : > { %p29_p1 = scmp.ge.s32.totalorder %s27_s21, 2  ;;  %p206_p2 = scmp.lt.s32.totalorder %s576_s20, 3 }
   0x5   : > { %s671_s21 = smov (%p29_p1, %s27_s21), 0  ;;  %p207_p3 = pnand %p504_p0, %p206_p2 }
   0x6   : > { %p238_p4 = scmp.lt.s32.totalorder (!%p207_p3), %s568_s18, 1 }
   0x7   : > { %210 = sbr.rel (%p207_p3) target bundleno = 571 (0x23b), region = 40 }
   0xc   : > { %vm255_vm0 = vcmask 7168   ;;  %v578_v0 = vmov 0.0   ;;  %s673_s18 = smov (!%p238_p4, %s568_s18), 1  ;;  %vm579_vm1 = vmmov 0   ;;  %v271_v9 = vld [vmem:[%s663_s1] sm:$0x3] }
   0xd   : > { %256 = vst.msk [vmem:[#allocation2] sm:$0xff] %vm255_vm0, %v578_v0  ;;  %518 = vmatprep.subr.mxu0 %v578_v0  ;;  %523 = vmatprep.subr.mxu1 %v578_v0  ;;  %s513_s22 = sshll.u32 %s673_s18, 4  ;;  %vm273_vm2 = vcmask 64512   ;;  %v272_v10 = vld [vmem:[%s664_s2] sm:$0x3]  ;;  %vm354_vm3 = vcmask 1041408  }
   0xe   : > { %s245_s25 = scalar_lea.vmem %s662_s0, %s513_s22  ;;  %520 = vmatprep.mubr.msk.f32.mxu0 %vm579_vm1, %v578_v0  ;;  %525 = vmatprep.mubr.msk.f32.mxu1 %vm579_vm1, %v578_v0  ;;  %v348_v15 = vld [vmem:[%s665_s3] sm:$0xff]  ;;  %vm350_vm4 = vcmask 15360   ;;  %s507_s9 = sshll.u32 %s673_s18, 3 }
   0xf   : > { %v258_v1 = vld [vmem:[%s245_s25] sm:$0xff]  ;;  %v259_v2 = vld [vmem:[%s245_s25 + $0x8] sm:$0xff]  ;;  %s250_s12 = scalar_lea.vmem %s667_s5, %s507_s9 }
  0x10   : > { %v260_v3 = vadd.f32 %v259_v2, %v258_v1  ;;  %v349_v16 = vld [vmem:[%s666_s4] sm:$0xff] }
  0x12   : > { %261 = vadd.xlane.f32.xlu0 %v260_v3 }
  0x14   : > { %v257_v4 = vld [vmem:[#allocation2] sm:$0xff] }
  0x9b   : > { %v262_v5 = vpop.xlane.xlu0 %261 }
  0x9c   : > { %v263_v6 = vadd.f32 %v262_v5, %v257_v4 }
  0x9e   : > { %265 = vst.msk [vmem:[#allocation2] sm:$0xff] %vm255_vm0, %v263_v6 }
  0xa5   : > { %v269_v7 = vld [vmem:[#allocation2] sm:$0xff] }
  0xa6   : > { %v270_v8 = vmul.f32 0.00390625, %v269_v7 }
  0xa8   : > { %519 = vmatpush3.msra.mxu0 %v270_v8 }
  0xa9   : > { %521 = vmatmul.mubr.msk.f32.vlgmr.msra.gmra.mxu0 %vm273_vm2, %v271_v9 }
 0x169   : > { %v343_v11 = vpop.f32.mrf.mxu0 }
 0x16a   : > { %v344_v12 = vadd.f32 %v343_v11, %v272_v10 }
 0x16b   : > { %v522_v13 = vpop.f32.mrf.mxu0 }
 0x16c   : > { %v347_v14 = vmax.f32 %v344_v12, 0.0 }
 0x16e   : > { %524 = vmatpush3.msk.msra.mxu1 %vm354_vm3, %v347_v14 }
 0x16f   : > { %526 = vmatmul.mubr.msk.f32.vlgmr.msra.gmra.mxu1 %vm350_vm4, %v348_v15 }
 0x22f   : > { %v424_v17 = vpop.f32.mrf.mxu1 }
 0x230   : > { %v425_v18 = vadd.f32 %v424_v17, %v349_v16 }
 0x231   : > { %v527_v19 = vpop.f32.mrf.mxu1 }
 0x232   : > { %v428_v20 = vadd.f32 3.0, %v425_v18 }
 0x234   : > { %v429_v21 = vmax.f32 %v428_v20, 0.0 }
 0x236   : > { %v430_v22 = vmin.f32 %v429_v21, 6.0 }
 0x238   : > { %v431_v23 = vmul.f32 0.16666667, %v430_v22 }
 0x23a   : > { %432 = vst.msk [vmem:[%s250_s12] sm:$0xff] %vm255_vm0, %v431_v23 }
 0x23b PF: > { %s15_s20 = sadd.s32 1, %s576_s20   ;;  %s668_s18 = smov %s572_s19 }
 0x23c   : > { %p12_p5 = scmp.ge.s32.totalorder %s15_s20, 4   ;;  %s669_s19 = smov %s671_s21 }
 0x23e   :  { %14 = sbr.rel (!%p12_p5) target bundleno = 2 (0x2), region = 78 }

</bundles_post_ra>
